<compile_context>
chip_gen: v7x
topology: tpu7x:2x2x1
jax: 0.10.0
libtpu: 0.0.40
codegen_flags: <defaults>
</compile_context>

<pallas_src>
import jax
import jax.numpy as jnp
from jax.experimental import pallas as pl
from jax.experimental.pallas import tpu as pltpu


# ----------------------------- helpers --------------------------------------


def _round_up(x, m):
    return ((x + m - 1) // m) * m


def _choose_tile(dim, preferred, align):
    """Tile that is a multiple of `align`; full (aligned) extent if dim is small."""
    preferred = _round_up(preferred, align)
    padded_min = _round_up(dim, align)
    return padded_min if padded_min <= preferred else preferred


def _shrink(tile, align):
    """Halve a tile while keeping it a multiple of `align` (floor at align)."""
    return max(align, _round_up(tile // 2, align))


# ----------------------------- kernel ---------------------------------------


def _make_kernel(tr, tk, resident_d, use_scratch):
    """Tiled matmul body: D(tr,tk) @ S'(tk,tn) accumulated over the K grid axis."""

    def kernel(d_ref, s_ref, o_ref, *scratch):
        k = pl.program_id(2)

        if resident_d:
            # D is a single VMEM-resident block covering the whole (padded) dict;
            # slice the current (tr, tk) tile out of it.
            r0 = pl.multiple_of(pl.program_id(0) * tr, tr)
            k0 = pl.multiple_of(k * tk, tk)
            d_tile = d_ref[pl.ds(r0, tr), pl.ds(k0, tk)]
        else:
            d_tile = d_ref[...]

        partial = jnp.dot(d_tile, s_ref[...], preferred_element_type=jnp.float32)

        if use_scratch:
            acc_ref = scratch[0]

            @pl.when(k == 0)
            def _init():
                acc_ref[...] = partial

            @pl.when(k != 0)
            def _accum():
                acc_ref[...] += partial

            @pl.when(k == pl.num_programs(2) - 1)
            def _finalize():
                o_ref[...] = acc_ref[...].astype(o_ref.dtype)

        else:
            # f32 output: accumulate directly into the resident output tile.
            @pl.when(k == 0)
            def _init():
                o_ref[...] = partial

            @pl.when(k != 0)
            def _accum():
                o_ref[...] += partial

    return kernel


# ----------------------------- wrapper ---------------------------------------


def synthesis_dict_forward(
    synthesis_dict,
    sparse_code,
    *,
    tr=256,
    tn=2048,
    tk=512,
    compute_dtype=None,  # e.g. jnp.bfloat16 for the MXU fast path (f32 accumulate)
):
    """out[n] = synthesis_dict @ sparse_code[n]  (torch.bmm with expanded LHS)."""
    R, K = synthesis_dict.shape
    N, K2, V = sparse_code.shape
    assert K == K2, "col_synthesis_dict mismatch"
    NV = N * V

    out_dtype = jnp.result_type(synthesis_dict.dtype, sparse_code.dtype)

    d = synthesis_dict
    s = sparse_code
    if compute_dtype is not None:
        d = d.astype(compute_dtype)
        s = s.astype(compute_dtype)
    in_dtype = jnp.result_type(d.dtype, s.dtype)
    in_bytes = jnp.dtype(in_dtype).itemsize
    out_bytes = jnp.dtype(out_dtype).itemsize

    # Fold the batch into the lane dimension: (N, K, V) -> (K, N*V) so the whole
    # forward is ONE lane-dense 2-D matmul D(R,K) @ S'(K, N*V).
    # TODO(synk): for HBM-bound shapes this fold and the final unfold are each an
    # extra XLA pass over S / out; fuse them into the kernel (3-D blocks +
    # in-kernel einshape) or keep the folded layout downstream when possible.
    s2d = jnp.transpose(s, (1, 0, 2)).reshape(K, NV)

    # ---- tile selection ------------------------------------------------------
    sub_align = 8 if in_bytes >= 4 else (16 if in_bytes == 2 else 32)
    tr = _choose_tile(R, tr, sub_align)   # sublane dim of D / out
    tk = _choose_tile(K, tk, 128)         # lane dim of D, sublane dim of S'
    tn = _choose_tile(NV, tn, 128)        # lane dim of S' / out

    # Generation-aware VMEM budget (v7x: 64 MiB, v5e/v6e: 128 MiB).
    try:
        vmem_cap = int(getattr(pltpu.get_tpu_info(), "vmem_capacity_bytes"))
    except Exception:  # conservative fallback if introspection is unavailable
        vmem_cap = 64 << 20
    budget = int(vmem_cap * 0.45)

    use_scratch = out_dtype != jnp.float32

    def _resident_d_ok(tr_, tk_):
        # Keep the whole (padded) dictionary resident in VMEM when it is small.
        return _round_up(R, tr_) * _round_up(K, tk_) * in_bytes <= (4 << 20)

    def _vmem_bytes(tr_, tn_, tk_):
        if _resident_d_ok(tr_, tk_):
            d_b = 2 * _round_up(R, tr_) * _round_up(K, tk_) * in_bytes
        else:
            d_b = 2 * tr_ * tk_ * in_bytes
        s_b = 2 * tk_ * tn_ * in_bytes
        o_b = 2 * tr_ * tn_ * out_bytes
        a_b = tr_ * tn_ * 4 if use_scratch else 0
        return d_b + s_b + o_b + a_b

    while _vmem_bytes(tr, tn, tk) > budget and tn > 128:
        tn = _shrink(tn, 128)
    while _vmem_bytes(tr, tn, tk) > budget and tk > 128:
        tk = _shrink(tk, 128)
    while _vmem_bytes(tr, tn, tk) > budget and tr > sub_align:
        tr = _shrink(tr, sub_align)

    # Megacore (v7x has 2 TensorCores): keep >= 2 independent output tiles on the
    # parallel axes when the shape allows it.
    while ((_round_up(R, tr) // tr) * (_round_up(NV, tn) // tn)) < 2 and tn > 128:
        tn = _shrink(tn, 128)

    Rp = _round_up(R, tr)
    Kp = _round_up(K, tk)
    NVp = _round_up(NV, tn)
    resident_d = _resident_d_ok(tr, tk)

    # ---- pad to tile multiples (zero-padding K is exact for the reduction) ----
    d_p = d if (Rp, Kp) == (R, K) else jnp.pad(d, ((0, Rp - R), (0, Kp - K)))
    s_p = s2d if (Kp, NVp) == (K, NV) else jnp.pad(s2d, ((0, Kp - K), (0, NVp - NV)))

    grid = (Rp // tr, NVp // tn, Kp // tk)

    if resident_d:
        d_spec = pl.BlockSpec((Rp, Kp), lambda i, j, k: (0, 0))
    else:
        d_spec = pl.BlockSpec((tr, tk), lambda i, j, k: (i, k))
    s_spec = pl.BlockSpec((tk, tn), lambda i, j, k: (k, j))
    o_spec = pl.BlockSpec((tr, tn), lambda i, j, k: (i, j))

    scratch_shapes = [pltpu.VMEM((tr, tn), jnp.float32)] if use_scratch else []

    flops = 2 * R * K * NV
    bytes_accessed = (R * K + N * K * V) * in_bytes + N * R * V * out_bytes
    vmem_limit = min(int(vmem_cap * 0.75), 96 * 1024 * 1024)

    out2d = pl.pallas_call(
        _make_kernel(tr, tk, resident_d, use_scratch),
        out_shape=jax.ShapeDtypeStruct((Rp, NVp), out_dtype),
        grid=grid,
        in_specs=[d_spec, s_spec],
        out_specs=o_spec,
        scratch_shapes=scratch_shapes,
        compiler_params=pltpu.CompilerParams(
            dimension_semantics=("parallel", "parallel", "arbitrary"),
            vmem_limit_bytes=vmem_limit,
        ),
        cost_estimate=pl.CostEstimate(
            flops=flops, transcendentals=0, bytes_accessed=bytes_accessed
        ),
    )(d_p, s_p)

    # Unpad + unfold: (Rp, NVp) -> (R, N*V) -> (N, R, V).
    out2d = out2d[:R, :NV]
    return jnp.transpose(out2d.reshape(R, N, V), (1, 0, 2))


def make_synthesis_dict_params(key, row_sample, col_synthesis_dict):
    """Deterministic replica of reset_parameters(): U(-stdv, stdv), stdv=1/sqrt(row_sample)."""
    stdv = 1.0 / (row_sample ** 0.5)
    return jax.random.uniform(
        key,
        (row_sample, col_synthesis_dict),
        minval=-stdv,
        maxval=stdv,
        dtype=jnp.float32,
    )


if __name__ == "__main__":
    # Small, module-consistent shapes.
    num_sample = 2            # batch of bmm
    row_sample = 32           # rows of the dictionary
    col_synthesis_dict = 16   # shared contraction dim
    num_views = 8             # columns of Sparse_Code

    key = jax.random.PRNGKey(0)
    k_dict, k_code = jax.random.split(key)

    synthesis_dict = make_synthesis_dict_params(k_dict, row_sample, col_synthesis_dict)
    sparse_code = jax.random.normal(
        k_code, (num_sample, col_synthesis_dict, num_views), dtype=jnp.float32
    )

    fwd = jax.jit(lambda d_, s_: synthesis_dict_forward(d_, s_))
    out = fwd(synthesis_dict, sparse_code)
    out = jax.block_until_ready(out)

    # Reference check (pure JAX): out[n] = D @ S[n]
    ref = jnp.einsum("rk,nkv->nrv", synthesis_dict, sparse_code)
    assert out.shape == (num_sample, row_sample, num_views)
    assert jnp.allclose(out, ref, atol=1e-5, rtol=1e-5)

    print("KERNEL_OK")
</pallas_src>

<mosaic_0001>
module attributes {stable_mosaic.version = 11 : i64} {
  func.func @kernel(%arg0: i32, %arg1: i32, %arg2: i32, %arg3: memref<32x128xf32, #tpu.memory_space<vmem>>, %arg4: memref<128x128xf32, #tpu.memory_space<vmem>>, %arg5: memref<32x128xf32, #tpu.memory_space<vmem>>) attributes {dimension_semantics = [#tpu.dimension_semantics<parallel>, #tpu.dimension_semantics<parallel>, #tpu.dimension_semantics<arbitrary>], iteration_bounds = array<i64: 1, 1, 1>, scalar_prefetch = 0 : i64, scratch_operands = 0 : i64, tpu.core_type = #tpu.core_type<tc>, window_params = [{pipeline_mode = #tpu.pipeline_mode<synchronous>, transform_indices = @transform_0, window_bounds = array<i64: 32, 128>}, {transform_indices = @transform_1, window_bounds = array<i64: 128, 128>}, {transform_indices = @transform_2, window_bounds = array<i64: 32, 128>}]} {
    %c32_i32 = arith.constant 32 : i32
    %0 = arith.muli %arg0, %c32_i32 : i32
    %1 = tpu.assume_multiple %0, 32 : i32
    %c128_i32 = arith.constant 128 : i32
    %2 = arith.muli %arg2, %c128_i32 : i32
    %3 = tpu.assume_multiple %2, 128 : i32
    %4 = arith.index_cast %1 : i32 to index
    %5 = arith.index_cast %3 : i32 to index
    %6 = vector.load %arg3[%4, %5] : memref<32x128xf32, #tpu.memory_space<vmem>>, vector<32x128xf32>
    %c0 = arith.constant 0 : index
    %c0_0 = arith.constant 0 : index
    %7 = vector.load %arg4[%c0, %c0_0] : memref<128x128xf32, #tpu.memory_space<vmem>>, vector<128x128xf32>
    %cst = arith.constant dense<0.000000e+00> : vector<32x128xf32>
    %8 = tpu.matmul %6, %7, %cst {dimension_numbers = #tpu.dot_dimension_numbers<[1], [0], [0], [1], [0, 0, 1, 1], [], []>} : vector<32x128xf32>, vector<128x128xf32>, vector<32x128xf32> -> vector<32x128xf32>
    %c0_i32 = arith.constant 0 : i32
    %9 = arith.cmpi eq, %arg2, %c0_i32 : i32
    %10 = arith.extui %9 : i1 to i32
    %c0_i32_1 = arith.constant 0 : i32
    %11 = arith.cmpi ne, %10, %c0_i32_1 : i32
    scf.if %11 {
      %c0_4 = arith.constant 0 : index
      %c0_5 = arith.constant 0 : index
      %15 = vector.load %arg5[%c0_4, %c0_5] : memref<32x128xf32, #tpu.memory_space<vmem>>, vector<32x128xf32>
      tpu.vector_store %arg5[%c0_4, %c0_5], %8 {strides = array<i32>} : memref<32x128xf32, #tpu.memory_space<vmem>>, vector<32x128xf32>,
    } else {
    }
    %c0_i32_2 = arith.constant 0 : i32
    %12 = arith.cmpi ne, %arg2, %c0_i32_2 : i32
    %13 = arith.extui %12 : i1 to i32
    %c0_i32_3 = arith.constant 0 : i32
    %14 = arith.cmpi ne, %13, %c0_i32_3 : i32
    scf.if %14 {
      %c0_4 = arith.constant 0 : index
      %c0_5 = arith.constant 0 : index
      %15 = vector.load %arg5[%c0_4, %c0_5] : memref<32x128xf32, #tpu.memory_space<vmem>>, vector<32x128xf32>
      %16 = arith.addf %15, %8 : vector<32x128xf32>
      %c0_6 = arith.constant 0 : index
      %c0_7 = arith.constant 0 : index
      %17 = vector.load %arg5[%c0_6, %c0_7] : memref<32x128xf32, #tpu.memory_space<vmem>>, vector<32x128xf32>
      tpu.vector_store %arg5[%c0_6, %c0_7], %16 {strides = array<i32>} : memref<32x128xf32, #tpu.memory_space<vmem>>, vector<32x128xf32>,
    } else {
    }
    return
  }
  func.func @transform_0(%arg0: i32, %arg1: i32, %arg2: i32) -> (i32, i32) {
    %c0_i32 = arith.constant 0 : i32
    %c0_i32_0 = arith.constant 0 : i32
    %c0_i32_1 = arith.constant 0 : i32
    return %c0_i32, %c0_i32_0 : i32, i32
  }
  func.func @transform_1(%arg0: i32, %arg1: i32, %arg2: i32) -> (i32, i32) {
    %c0_i32 = arith.constant 0 : i32
    return %arg2, %arg1 : i32, i32
  }
  func.func @transform_2(%arg0: i32, %arg1: i32, %arg2: i32) -> (i32, i32) {
    %c0_i32 = arith.constant 0 : i32
    return %arg0, %arg1 : i32, i32
  }
}

</mosaic_0001>

<bundles_post_ra>
// kernel: _lambda_.1
= control target key start
LH: loop header
LB: loop body
LE: loop exit
PB: predicated region body
PF: predicated region fallthrough
CT: control target
= control target key end

     0   :  { %s344_s1 = inlined_call_operand.vmem [shape: f32[128,128], index: 1, kind: input, shape index: {}]   ;;  %s345_s0 = inlined_call_operand.vmem [shape: f32[32,128], index: 0, kind: input, shape index: {}]   ;;  %s346_s2 = inlined_call_operand.vmem [shape: f32[32,128], index: 2, kind: output, shape index: {}]  }
   0x1   :  { %v21_v0 = vld [vmem:[%s344_s1] sm:$0xff]  ;;  %v22_v1 = vld [vmem:[%s344_s1 + $0x8] sm:$0xff]  ;;  %v23_v2 = vld [vmem:[%s344_s1 + $0x10] sm:$0xff] }
   0x2   :  { %v209_v3 = vpack.c.bf16 %v22_v1, %v21_v0  ;;  %v24_v4 = vld [vmem:[%s344_s1 + $0x18] sm:$0xff]  ;;  %v25_v6 = vld [vmem:[%s344_s1 + $0x20] sm:$0xff]  ;;  %v26_v7 = vld [vmem:[%s344_s1 + $0x28] sm:$0xff] }
   0x3   :  { %v213_v5 = vpack.c.bf16 %v24_v4, %v23_v2  ;;  %v217_v8 = vpack.c.bf16 %v26_v7, %v25_v6  ;;  %v17_v9 = vld [vmem:[%s345_s0] sm:$0xff]  ;;  %v19_v10 = vld [vmem:[%s345_s0 + $0x10] sm:$0xff]  ;;  %v28_v12 = vld [vmem:[%s344_s1 + $0x38] sm:$0xff] }
   0x4   :  { %210 = vmatprep.subr.bf16.mxu0 %v209_v3  ;;  %241 = vmatprep.subr.bf16.mxu1 %v209_v3  ;;  %v27_v11 = vld [vmem:[%s344_s1 + $0x30] sm:$0xff]  ;;  %v29_v14 = vld [vmem:[%s344_s1 + $0x40] sm:$0xff]  ;;  %v30_v15 = vld [vmem:[%s344_s1 + $0x48] sm:$0xff] }
   0x5   :  { %212 = vmatpush3.bf16.msra.mxu0 %v209_v3  ;;  %249 = vmatpush3.bf16.msra.mxu1 %v209_v3  ;;  %v221_v13 = vpack.c.bf16 %v28_v12, %v27_v11  ;;  %v225_v16 = vpack.c.bf16 %v30_v15, %v29_v14  ;;  %v31_v17 = vld [vmem:[%s344_s1 + $0x50] sm:$0xff]  ;;  %v32_v18 = vld [vmem:[%s344_s1 + $0x58] sm:$0xff]  ;;  %v33_v20 = vld [vmem:[%s344_s1 + $0x60] sm:$0xff] }
   0x6   :  { %214 = vmatprep.subr.bf16.mxu0 %v213_v5  ;;  %242 = vmatprep.subr.bf16.mxu1 %v213_v5  ;;  %v229_v19 = vpack.c.bf16 %v32_v18, %v31_v17  ;;  %v34_v21 = vld [vmem:[%s344_s1 + $0x68] sm:$0xff]  ;;  %v35_v23 = vld [vmem:[%s344_s1 + $0x70] sm:$0xff]  ;;  %v36_v24 = vld [vmem:[%s344_s1 + $0x78] sm:$0xff] }
   0x7   :  { %203 = vmatprep.mubr.f32.mxu0 %v17_v9  ;;  %206 = vmatprep.mubr.f32.mxu1 %v19_v10  ;;  %v233_v22 = vpack.c.bf16 %v34_v21, %v33_v20  ;;  %v237_v25 = vpack.c.bf16 %v36_v24, %v35_v23  ;;  %v18_v26 = vld [vmem:[%s345_s0 + $0x8] sm:$0xff]  ;;  %v20_v27 = vld [vmem:[%s345_s0 + $0x18] sm:$0xff] }
   0x9   :  { %216 = vmatpush3.bf16.msra.mxu0 %v213_v5  ;;  %250 = vmatpush3.bf16.msra.mxu1 %v213_v5 }
   0xa   :  { %218 = vmatprep.subr.bf16.mxu0 %v217_v8  ;;  %243 = vmatprep.subr.bf16.mxu1 %v217_v8 }
   0xd   :  { %220 = vmatpush3.bf16.msra.mxu0 %v217_v8  ;;  %251 = vmatpush3.bf16.msra.mxu1 %v217_v8 }
   0xe   :  { %222 = vmatprep.subr.bf16.mxu0 %v221_v13  ;;  %244 = vmatprep.subr.bf16.mxu1 %v221_v13 }
  0x11   :  { %224 = vmatpush3.bf16.msra.mxu0 %v221_v13  ;;  %252 = vmatpush3.bf16.msra.mxu1 %v221_v13 }
  0x12   :  { %226 = vmatprep.subr.bf16.mxu0 %v225_v16  ;;  %245 = vmatprep.subr.bf16.mxu1 %v225_v16 }
  0x15   :  { %228 = vmatpush3.bf16.msra.mxu0 %v225_v16  ;;  %253 = vmatpush3.bf16.msra.mxu1 %v225_v16 }
  0x16   :  { %230 = vmatprep.subr.bf16.mxu0 %v229_v19  ;;  %246 = vmatprep.subr.bf16.mxu1 %v229_v19 }
  0x19   :  { %232 = vmatpush3.bf16.msra.mxu0 %v229_v19  ;;  %254 = vmatpush3.bf16.msra.mxu1 %v229_v19 }
  0x1a   :  { %234 = vmatprep.subr.bf16.mxu0 %v233_v22  ;;  %247 = vmatprep.subr.bf16.mxu1 %v233_v22 }
  0x1d   :  { %236 = vmatpush3.bf16.msra.mxu0 %v233_v22  ;;  %255 = vmatpush3.bf16.msra.mxu1 %v233_v22 }
  0x1e   :  { %238 = vmatprep.subr.bf16.mxu0 %v237_v25  ;;  %248 = vmatprep.subr.bf16.mxu1 %v237_v25 }
  0x21   :  { %240 = vmatpush3.bf16.msra.mxu0 %v237_v25  ;;  %256 = vmatpush3.bf16.msra.mxu1 %v237_v25 }
  0x24   :  { %204 = vmatmul.mubr.f32.vlgmr.msra.gmra.mrb[0].mxu0 %v18_v26  ;;  %207 = vmatmul.mubr.f32.vlgmr.msra.gmra.mrb[0].mxu1 %v20_v27 }
  0xf7   :  { %v205_v28 = vpop.f32.mrb[0].mxu0  ;;  %v208_v29 = vpop.f32.mrb[0].mxu1 }
  0xf8   :  { %127 = vst [vmem:[%s346_s2 + $0x8] sm:$0xff] %v205_v28  ;;  %129 = vst [vmem:[%s346_s2 + $0x18] sm:$0xff] %v208_v29  ;;  %v103_v30 = vpop.f32.mrb[1].mxu0  ;;  %v113_v31 = vpop.f32.mrb[1].mxu1 }
  0xf9   :  { %126 = vst [vmem:[%s346_s2] sm:$0xff] %v103_v30  ;;  %128 = vst [vmem:[%s346_s2 + $0x10] sm:$0xff] %v113_v31 }

</bundles_post_ra>
